<compile_context>
chip_gen: v7x
topology: tpu7x:2x2x1
jax: 0.10.0
libtpu: 0.0.40
codegen_flags: <defaults>
</compile_context>

<pallas_src>
from typing import NamedTuple, Dict

import jax
import jax.numpy as jnp
from jax.experimental import pallas as pl
from jax.experimental.pallas import tpu as pltpu


class VSRModelOutput(NamedTuple):
    reconstruction: jax.Array
    loss: Dict[str, jax.Array]


def _bilinear_matrix(in_size: int, out_size: int) -> jax.Array:
    """(out_size, in_size) matrix implementing 1-D bilinear resize with
    half-pixel centers (PyTorch align_corners=False)."""
    o = jnp.arange(out_size, dtype=jnp.float32)
    src = (o + 0.5) * (in_size / out_size) - 0.5
    i0 = jnp.floor(src)
    frac = src - i0
    i0c = jnp.clip(i0, 0, in_size - 1).astype(jnp.int32)
    i1c = jnp.clip(i0 + 1, 0, in_size - 1).astype(jnp.int32)
    cols = jnp.arange(in_size, dtype=jnp.int32)
    w0 = (1.0 - frac)[:, None] * (cols[None, :] == i0c[:, None]).astype(jnp.float32)
    w1 = frac[:, None] * (cols[None, :] == i1c[:, None]).astype(jnp.float32)
    return w0 + w1  # (out_size, in_size)


def _vmem_bytes(T: int, H: int, W: int,
                in_isz: int, lbl_isz: int, out_isz: int, a_isz: int) -> int:
    """Conservative VMEM estimate for one (plane, row-tile) grid step."""
    W2 = 2 * W
    lane = 2 * W2                              # output tile lane width (4W)
    b = 2 * H * W * in_isz                     # resident input plane, double-buffered
    b += 2 * T * lane * lbl_isz                # labels tile, double-buffered
    b += 2 * T * lane * out_isz                # reconstruction tile, double-buffered
    b += 2 * W * W2 * a_isz                    # A_w^T (counted double-buffered)
    b += T * lane * 4                          # MAE accumulator scratch (f32)
    b += (5 * T * W + 4 * T * lane) * 4        # f32 temporaries (xc/xm/xp/v_e/v_o,
                                               #   rec halves/pair/diff/labels cast)
    return b


def _choose_row_tile(H: int, W: int, in_isz: int, lbl_isz: int,
                     out_isz: int, a_isz: int, budget_bytes: int):
    """Largest input-row tile T (T | H, T % 8 == 0 or T == H) under budget."""
    cands = sorted({d for d in range(8, H + 1, 8) if H % d == 0} | {H},
                   reverse=True)
    for T in cands:
        est = _vmem_bytes(T, H, W, in_isz, lbl_isz, out_isz, a_isz)
        if est <= budget_bytes:
            return T, est
    T = cands[-1]
    return T, _vmem_bytes(T, H, W, in_isz, lbl_isz, out_isz, a_isz)


def _vmem_plan(H: int, W: int, in_isz: int, lbl_isz: int, out_isz: int,
               a_isz: int):
    """Generation-aware row tile + vmem_limit_bytes (v7x: 64 MiB, v5e/v6e: 128 MiB)."""
    try:
        cap = int(pltpu.get_tpu_info().vmem_capacity_bytes)
    except Exception:
        cap = 64 * 1024 * 1024                 # conservative: v7x per-TensorCore VMEM
    limit = min(int(cap * 0.6), 100 * 1024 * 1024)   # ~38 MiB v7x, ~77 MiB v5e/v6e
    budget = int(limit * 0.8)                        # headroom for Mosaic scratch
    T, est = _choose_row_tile(H, W, in_isz, lbl_isz, out_isz, a_isz, budget)
    limit = max(limit, min(int(cap * 0.9), int(est * 1.3)))
    return T, int(limit)


def _sr_kernel(a_wt_ref, x_ref, y_ref, rec_ref, part_ref, mae_acc):
    """One grid step: one plane, one row tile of T input rows.

    Vertical 2x bilinear = 2-tap VPU (0.75 * x[i] + 0.25 * x[i +- 1], clamped);
    horizontal 2x bilinear = MXU matmul with the resident (W, 2W) matrix (this
    also performs the column interleave).  Even/odd output rows land in lane
    halves [0:2W] / [2W:4W]; the (nc, H, 4W) HBM layout makes the row
    interleave a free reshape in the wrapper.
    """
    r = pl.program_id(1)
    nr = pl.num_programs(1)
    H = x_ref.shape[1]
    T = rec_ref.shape[1]

    @pl.when(r == 0)
    def _():
        mae_acc[...] = jnp.zeros_like(mae_acc)

    i0 = r * T
    i0c = pl.multiple_of(i0, 8) if T % 8 == 0 else i0

    # Center rows and one-row halos (clamped at the image border).
    xc = x_ref[0, pl.ds(i0c, T), :].astype(jnp.float32)                    # (T, W)
    top = x_ref[0, pl.ds(jnp.maximum(i0 - 1, 0), 1), :].astype(jnp.float32)     # (1, W)
    bot = x_ref[0, pl.ds(jnp.minimum(i0 + T, H - 1), 1), :].astype(jnp.float32)  # (1, W)

    xm = jnp.concatenate([top, xc[:T - 1, :]], axis=0)   # rows i-1 (clamped), (T, W)
    xp = jnp.concatenate([xc[1:, :], bot], axis=0)       # rows i+1 (clamped), (T, W)

    # 2-tap vertical bilinear (VPU, f32):
    #   output row 2i   = 0.75 * x[i] + 0.25 * x[i-1]
    #   output row 2i+1 = 0.75 * x[i] + 0.25 * x[i+1]
    v_e = 0.75 * xc + 0.25 * xm
    v_o = 0.75 * xc + 0.25 * xp

    # Horizontal bilinear on the MXU; bf16 operands when the input is bf16
    # (native MXU rate on v6e/v7x), f32 accumulation either way.
    a_wt = a_wt_ref[...]
    mdt = a_wt.dtype
    rec_e = jnp.dot(v_e.astype(mdt), a_wt, preferred_element_type=jnp.float32)  # (T, 2W)
    rec_o = jnp.dot(v_o.astype(mdt), a_wt, preferred_element_type=jnp.float32)  # (T, 2W)

    # Lanes [0:2W] = output row 2i, lanes [2W:4W] = output row 2i+1.
    rec_pair = jnp.concatenate([rec_e, rec_o], axis=-1)   # (T, 4W) f32

    rec_ref[0] = rec_pair.astype(rec_ref.dtype)

    # Elementwise |rec - labels| accumulation (pure VPU, no per-step XLU reduce).
    # TODO(synk): loss is taken on the pre-cast f32 reconstruction; identical
    # for f32 inputs, slightly higher precision than PyTorch for bf16 inputs.
    diff = jnp.abs(rec_pair - y_ref[0].astype(jnp.float32))
    mae_acc[...] = mae_acc[...] + diff

    @pl.when(r == nr - 1)
    def _():
        # One scalar reduction per plane (not per step).
        part_ref[...] = jnp.reshape(jnp.sum(mae_acc[...]), (1, 1, 1))


def dummy_bilinear_sr_forward(frames: jax.Array, labels: jax.Array,
                              training: bool = True) -> VSRModelOutput:
    N, C, H, W = frames.shape
    H2, W2 = 2 * H, 2 * W
    assert labels.shape == (N, C, H2, W2)
    assert H >= 2, "vertical 2-tap path expects at least 2 input rows"

    nc = N * C
    lane = 2 * W2                      # 4W: lane width of the output/label tiles
    x = frames.reshape(nc, H, W)
    # (nc, 2H, 2W) and (nc, H, 4W) are the same contiguous buffer: rows 2i and
    # 2i+1 sit side by side along lanes -> lane-dense tiles, free reshape back.
    y = labels.reshape(nc, H, lane)

    # Horizontal bilinear matrix A_w^T (W, 2W); 2x weights 0.25/0.75 are exact
    # in bf16, so keep bf16 inputs in bf16 for the MXU.
    a_dtype = jnp.bfloat16 if frames.dtype == jnp.bfloat16 else jnp.float32
    a_wt = _bilinear_matrix(W, W2).T.astype(a_dtype)   # (W, 2W)

    in_isz = jnp.dtype(frames.dtype).itemsize
    lbl_isz = jnp.dtype(labels.dtype).itemsize
    a_isz = jnp.dtype(a_dtype).itemsize
    T, vmem_limit = _vmem_plan(H, W, in_isz, lbl_isz, in_isz, a_isz)
    nr = H // T

    recon_flat, partials = pl.pallas_call(
        _sr_kernel,
        out_shape=(
            jax.ShapeDtypeStruct((nc, H, lane), frames.dtype),
            jax.ShapeDtypeStruct((nc, 1, 1), jnp.float32),
        ),
        grid_spec=pltpu.PrefetchScalarGridSpec(
            num_scalar_prefetch=0,
            grid=(nc, nr),
            in_specs=[
                # A_w^T, constant across the grid (stays resident, no re-DMA).
                pl.BlockSpec((W, W2), lambda p, r: (0, 0)),
                # Input plane: resident across the row-tile axis.
                pl.BlockSpec((1, H, W), lambda p, r: (p, 0, 0)),
                # Label rows for this (plane, row tile), lane-dense (4W wide).
                # NOTE: pipeline depth (pl.Buffered(3)) on the streamed
                # labels / reconstruction blocks is a further tuning knob.
                pl.BlockSpec((1, T, lane), lambda p, r: (p, r, 0)),
            ],
            out_specs=[
                pl.BlockSpec((1, T, lane), lambda p, r: (p, r, 0)),
                # Per-plane MAE partial, accumulated only across r -> the plane
                # axis stays 'parallel' (v7x megacore safe).
                pl.BlockSpec((1, 1, 1), lambda p, r: (p, 0, 0)),
            ],
            scratch_shapes=[pltpu.VMEM((T, lane), jnp.float32)],
        ),
        compiler_params=pltpu.CompilerParams(
            dimension_semantics=("parallel", "arbitrary"),
            vmem_limit_bytes=vmem_limit,
        ),
    )(a_wt, x, y)

    reconstruction = recon_flat.reshape(N, C, H2, W2)   # pure view, no data movement
    loss: Dict[str, jax.Array] = {}
    if training:
        loss["MAE"] = jnp.sum(partials) / float(nc * H2 * W2)
    return VSRModelOutput(reconstruction=reconstruction, loss=loss)


if __name__ == "__main__":
    key = jax.random.PRNGKey(0)
    k_f, k_l, k_w, k_b = jax.random.split(key, 4)

    N, C, H, W = 2, 3, 16, 16
    frames = jax.random.normal(k_f, (N, C, H, W), dtype=jnp.float32)
    labels = jax.random.normal(k_l, (N, C, 2 * H, 2 * W), dtype=jnp.float32)

    # Deterministic params for the unused Conv2d(1, 1, 1) "dummy" layer.
    dummy_weight = jax.random.normal(k_w, (1, 1, 1, 1), dtype=jnp.float32)
    dummy_bias = jax.random.normal(k_b, (1,), dtype=jnp.float32)
    # TODO(synk): Conv2d(1,1,1) is never used in forward(); parameters exist
    # only for module parity.

    out = dummy_bilinear_sr_forward(frames, labels, training=True)
    jax.block_until_ready(out.reconstruction)
    jax.block_until_ready(out.loss["MAE"])

    # Pure-JAX reference check (bilinear, half-pixel centers == PyTorch
    # align_corners=False).
    ref_rec = jax.image.resize(frames, (N, C, 2 * H, 2 * W), method="bilinear")
    ref_mae = jnp.mean(jnp.abs(ref_rec - labels))
    assert out.reconstruction.shape == (N, C, 2 * H, 2 * W)
    assert jnp.allclose(out.reconstruction, ref_rec, atol=1e-5, rtol=1e-5)
    assert jnp.allclose(out.loss["MAE"], ref_mae, atol=1e-5, rtol=1e-5)

    print("KERNEL_OK")
</pallas_src>

<mosaic_0001>
module attributes {stable_mosaic.version = 11 : i64} {
  func.func @_sr_kernel(%arg0: i32, %arg1: i32, %arg2: memref<16x32xf32, #tpu.memory_space<vmem>>, %arg3: memref<1x16x16xf32, #tpu.memory_space<vmem>>, %arg4: memref<1x16x64xf32, #tpu.memory_space<vmem>>, %arg5: memref<1x16x64xf32, #tpu.memory_space<vmem>>, %arg6: memref<1x1x1xf32, #tpu.memory_space<vmem>>, %arg7: memref<16x64xf32, #tpu.memory_space<vmem>>) attributes {dimension_semantics = [#tpu.dimension_semantics<parallel>, #tpu.dimension_semantics<arbitrary>], iteration_bounds = array<i64: 6, 1>, scalar_prefetch = 0 : i64, scratch_operands = 1 : i64, tpu.core_type = #tpu.core_type<tc>, window_params = [{pipeline_mode = #tpu.pipeline_mode<synchronous>, transform_indices = @transform_0, window_bounds = array<i64: 16, 32>}, {transform_indices = @transform_1, window_bounds = array<i64: 1, 16, 16>}, {transform_indices = @transform_2, window_bounds = array<i64: 1, 16, 64>}, {transform_indices = @transform_3, window_bounds = array<i64: 1, 16, 64>}, {transform_indices = @transform_4, window_bounds = array<i64: 1, 1, 1>}]} {
    %c0_i32 = arith.constant 0 : i32
    %0 = arith.cmpi eq, %arg1, %c0_i32 : i32
    %1 = arith.extui %0 : i1 to i32
    %c0_i32_0 = arith.constant 0 : i32
    %2 = arith.cmpi ne, %1, %c0_i32_0 : i32
    scf.if %2 {
      %cst_27 = arith.constant 0.000000e+00 : f32
      %49 = vector.broadcast %cst_27 : f32 to vector<16x64xf32>
      %c0_28 = arith.constant 0 : index
      %c0_29 = arith.constant 0 : index
      %50 = vector.load %arg7[%c0_28, %c0_29] : memref<16x64xf32, #tpu.memory_space<vmem>>, vector<16x64xf32>
      tpu.vector_store %arg7[%c0_28, %c0_29], %49 {strides = array<i32>} : memref<16x64xf32, #tpu.memory_space<vmem>>, vector<16x64xf32>,
    } else {
    }
    %c16_i32 = arith.constant 16 : i32
    %3 = arith.muli %arg1, %c16_i32 : i32
    %4 = tpu.assume_multiple %3, 8 : i32
    %c0 = arith.constant 0 : index
    %5 = arith.index_cast %4 : i32 to index
    %c0_1 = arith.constant 0 : index
    %6 = vector.load %arg3[%c0, %5, %c0_1] : memref<1x16x16xf32, #tpu.memory_space<vmem>>, vector<1x16x16xf32>
    %7 = vector.shape_cast %6 : vector<1x16x16xf32> to vector<16x16xf32>
    %c1_i32 = arith.constant 1 : i32
    %8 = arith.subi %3, %c1_i32 : i32
    %c0_i32_2 = arith.constant 0 : i32
    %9 = arith.maxsi %8, %c0_i32_2 : i32
    %c0_3 = arith.constant 0 : index
    %10 = arith.index_cast %9 : i32 to index
    %c0_4 = arith.constant 0 : index
    %11 = vector.load %arg3[%c0_3, %10, %c0_4] : memref<1x16x16xf32, #tpu.memory_space<vmem>>, vector<1x1x16xf32>
    %12 = vector.shape_cast %11 : vector<1x1x16xf32> to vector<1x16xf32>
    %c16_i32_5 = arith.constant 16 : i32
    %13 = arith.addi %3, %c16_i32_5 : i32
    %c15_i32 = arith.constant 15 : i32
    %14 = arith.minsi %13, %c15_i32 : i32
    %c0_6 = arith.constant 0 : index
    %15 = arith.index_cast %14 : i32 to index
    %c0_7 = arith.constant 0 : index
    %16 = vector.load %arg3[%c0_6, %15, %c0_7] : memref<1x16x16xf32, #tpu.memory_space<vmem>>, vector<1x1x16xf32>
    %17 = vector.shape_cast %16 : vector<1x1x16xf32> to vector<1x16xf32>
    %18 = vector.extract_strided_slice %7 {offsets = [0, 0], sizes = [15, 16], strides = [1, 1]} : vector<16x16xf32> to vector<15x16xf32>
    %19 = tpu.concatenate %12, %18 in 0 : vector<1x16xf32>, vector<15x16xf32> -> vector<16x16xf32>
    %20 = vector.extract_strided_slice %7 {offsets = [1, 0], sizes = [15, 16], strides = [1, 1]} : vector<16x16xf32> to vector<15x16xf32>
    %21 = tpu.concatenate %20, %17 in 0 : vector<15x16xf32>, vector<1x16xf32> -> vector<16x16xf32>
    %cst = arith.constant 7.500000e-01 : f32
    %22 = vector.broadcast %cst : f32 to vector<16x16xf32>
    %23 = arith.mulf %22, %7 : vector<16x16xf32>
    %cst_8 = arith.constant 2.500000e-01 : f32
    %24 = vector.broadcast %cst_8 : f32 to vector<16x16xf32>
    %25 = arith.mulf %24, %19 : vector<16x16xf32>
    %26 = arith.addf %23, %25 : vector<16x16xf32>
    %cst_9 = arith.constant 7.500000e-01 : f32
    %27 = vector.broadcast %cst_9 : f32 to vector<16x16xf32>
    %28 = arith.mulf %27, %7 : vector<16x16xf32>
    %cst_10 = arith.constant 2.500000e-01 : f32
    %29 = vector.broadcast %cst_10 : f32 to vector<16x16xf32>
    %30 = arith.mulf %29, %21 : vector<16x16xf32>
    %31 = arith.addf %28, %30 : vector<16x16xf32>
    %c0_11 = arith.constant 0 : index
    %c0_12 = arith.constant 0 : index
    %32 = vector.load %arg2[%c0_11, %c0_12] : memref<16x32xf32, #tpu.memory_space<vmem>>, vector<16x32xf32>
    %cst_13 = arith.constant dense<0.000000e+00> : vector<16x32xf32>
    %33 = tpu.matmul %26, %32, %cst_13 {dimension_numbers = #tpu.dot_dimension_numbers<[1], [0], [0], [1], [0, 0, 1, 1], [], []>} : vector<16x16xf32>, vector<16x32xf32>, vector<16x32xf32> -> vector<16x32xf32>
    %cst_14 = arith.constant dense<0.000000e+00> : vector<16x32xf32>
    %34 = tpu.matmul %31, %32, %cst_14 {dimension_numbers = #tpu.dot_dimension_numbers<[1], [0], [0], [1], [0, 0, 1, 1], [], []>} : vector<16x16xf32>, vector<16x32xf32>, vector<16x32xf32> -> vector<16x32xf32>
    %35 = tpu.concatenate %33, %34 in 1 : vector<16x32xf32>, vector<16x32xf32> -> vector<16x64xf32>
    %c0_15 = arith.constant 0 : index
    %c0_16 = arith.constant 0 : index
    %c0_17 = arith.constant 0 : index
    %36 = vector.load %arg5[%c0_15, %c0_16, %c0_17] : memref<1x16x64xf32, #tpu.memory_space<vmem>>, vector<1x16x64xf32>
    %37 = vector.shape_cast %36 : vector<1x16x64xf32> to vector<16x64xf32>
    %38 = vector.shape_cast %35 : vector<16x64xf32> to vector<1x16x64xf32>
    tpu.vector_store %arg5[%c0_15, %c0_16, %c0_17], %38 {strides = array<i32>} : memref<1x16x64xf32, #tpu.memory_space<vmem>>, vector<1x16x64xf32>,
    %c0_18 = arith.constant 0 : index
    %c0_19 = arith.constant 0 : index
    %c0_20 = arith.constant 0 : index
    %39 = vector.load %arg4[%c0_18, %c0_19, %c0_20] : memref<1x16x64xf32, #tpu.memory_space<vmem>>, vector<1x16x64xf32>
    %40 = vector.shape_cast %39 : vector<1x16x64xf32> to vector<16x64xf32>
    %41 = arith.subf %35, %40 : vector<16x64xf32>
    %42 = math.absf %41 : vector<16x64xf32>
    %c0_21 = arith.constant 0 : index
    %c0_22 = arith.constant 0 : index
    %43 = vector.load %arg7[%c0_21, %c0_22] : memref<16x64xf32, #tpu.memory_space<vmem>>, vector<16x64xf32>
    %44 = arith.addf %43, %42 : vector<16x64xf32>
    %c0_23 = arith.constant 0 : index
    %c0_24 = arith.constant 0 : index
    %45 = vector.load %arg7[%c0_23, %c0_24] : memref<16x64xf32, #tpu.memory_space<vmem>>, vector<16x64xf32>
    tpu.vector_store %arg7[%c0_23, %c0_24], %44 {strides = array<i32>} : memref<16x64xf32, #tpu.memory_space<vmem>>, vector<16x64xf32>,
    %c0_i32_25 = arith.constant 0 : i32
    %46 = arith.cmpi eq, %arg1, %c0_i32_25 : i32
    %47 = arith.extui %46 : i1 to i32
    %c0_i32_26 = arith.constant 0 : i32
    %48 = arith.cmpi ne, %47, %c0_i32_26 : i32
    scf.if %48 {
      %c0_27 = arith.constant 0 : index
      %c0_28 = arith.constant 0 : index
      %49 = vector.load %arg7[%c0_27, %c0_28] : memref<16x64xf32, #tpu.memory_space<vmem>>, vector<16x64xf32>
      %50 = vector.shape_cast %49 : vector<16x64xf32> to vector<1x16x64xf32>
      %cst_29 = arith.constant dense<0.000000e+00> : vector<1xf32>
      %51 = vector.multi_reduction <add>, %50, %cst_29 [1, 2] : vector<1x16x64xf32> to vector<1xf32>
      %52 = vector.shape_cast %51 : vector<1xf32> to vector<1x1x1xf32>
      %53 = vector.extract %52[0, 0, 0] : f32 from vector<1x1x1xf32>
      %54 = vector.broadcast %53 : f32 to vector<1x1x1xf32>
      %c0_30 = arith.constant 0 : index
      %c0_31 = arith.constant 0 : index
      %c0_32 = arith.constant 0 : index
      %55 = vector.load %arg6[%c0_30, %c0_31, %c0_32] : memref<1x1x1xf32, #tpu.memory_space<vmem>>, vector<1x1x1xf32>
      tpu.vector_store %arg6[%c0_30, %c0_31, %c0_32], %54 {strides = array<i32>} : memref<1x1x1xf32, #tpu.memory_space<vmem>>, vector<1x1x1xf32>,
    } else {
    }
    return
  }
  func.func @transform_0(%arg0: i32, %arg1: i32) -> (i32, i32) {
    %c0_i32 = arith.constant 0 : i32
    %c0_i32_0 = arith.constant 0 : i32
    %c0_i32_1 = arith.constant 0 : i32
    return %c0_i32, %c0_i32_0 : i32, i32
  }
  func.func @transform_1(%arg0: i32, %arg1: i32) -> (i32, i32, i32) {
    %c0_i32 = arith.constant 0 : i32
    %c0_i32_0 = arith.constant 0 : i32
    %c0_i32_1 = arith.constant 0 : i32
    return %arg0, %c0_i32, %c0_i32_0 : i32, i32, i32
  }
  func.func @transform_2(%arg0: i32, %arg1: i32) -> (i32, i32, i32) {
    %c0_i32 = arith.constant 0 : i32
    %c0_i32_0 = arith.constant 0 : i32
    return %arg0, %arg1, %c0_i32 : i32, i32, i32
  }
  func.func @transform_3(%arg0: i32, %arg1: i32) -> (i32, i32, i32) {
    %c0_i32 = arith.constant 0 : i32
    %c0_i32_0 = arith.constant 0 : i32
    return %arg0, %arg1, %c0_i32 : i32, i32, i32
  }
  func.func @transform_4(%arg0: i32, %arg1: i32) -> (i32, i32, i32) {
    %c0_i32 = arith.constant 0 : i32
    %c0_i32_0 = arith.constant 0 : i32
    %c0_i32_1 = arith.constant 0 : i32
    return %arg0, %c0_i32, %c0_i32_0 : i32, i32, i32
  }
}

</mosaic_0001>

<bundles_post_ra>
// kernel: tpu_custom_call.1
= control target key start
LH: loop header
LB: loop body
LE: loop exit
PB: predicated region body
PF: predicated region fallthrough
CT: control target
= control target key end

     0   :  { %10 = vsyncpa [#allocation4], 0  ;;  %s1367_s0 = inlined_call_operand.hbm [shape: f32[16,32], index: 0, kind: input, shape index: {}]   ;;  %s1368_s1 = inlined_call_operand.hbm [shape: f32[6,16,16], index: 1, kind: input, shape index: {}]   ;;  %s1369_s2 = inlined_call_operand.hbm [shape: f32[6,16,64], index: 2, kind: input, shape index: {}]   ;;  %s1370_s3 = inlined_call_operand.hbm [shape: f32[6,16,64], index: 3, kind: output, shape index: {0}]   ;;  %s1371_s4 = inlined_call_operand.vmem [shape: f32[6,1,1], index: 4, kind: output, shape index: {1}]  }
   0x1   :  { %11 = vsyncpa [#allocation7], 0 }
   0x2   :  { %13 = vsyncpa [#allocation7 + $0x1], 0 }
   0x3   :  { %14 = vsyncpa [#allocation5], 0 }
   0x4   :  { %16 = vsyncpa [#allocation5 + $0x1], 0  ;;  %s1078_s15 = smov 0   ;;  %s1080_s16 = smov 0  }
   0x5   :  { %s1082_s17 = smov 0   ;;  %s1084_s18 = smov 0  }
   0x6   :  { %s1086_s19 = smov 0   ;;  %s1088_s20 = smov 0  }
   0x7 LB: > { %s34_s21 = sadd.s32 1, %s1037_s19  ;;  %s62_s22 = sadd.s32 1, %s1029_s17  ;;  %s1041_s20 = sphi %s1088_s20, %s22_s20   ;;  %s1037_s19 = sphi %s1086_s19, %s1398_s19   ;;  %s1033_s18 = sphi %s1084_s18, %s1397_s18   ;;  %s1029_s17 = sphi %s1082_s17, %s1396_s17   ;;  %s1025_s16 = sphi %s1080_s16, %s1395_s16   ;;  %s1021_s15 = sphi %s1078_s15, %s1394_s15  }
   0x8   : > { %p36_p0 = scmp.ge.s32.totalorder %s34_s21, 6  ;;  %p69_p1 = scmp.ne.s32.totalorder %s1029_s17, %s1025_s16 }
   0x9   : > { %p70_p2 = scmp.eq.s32.totalorder %s1041_s20, 0  ;;  %p809_p5 = scmp.lt.s32.totalorder %s1041_s20, 6 }
   0xa   : > { %s1400_s21 = smov (%p36_p0, %s34_s21), 0  ;;  %s194_s25 = sand.u32 1, %s1041_s20  }
   0xb   : > { %p1118_p3 = por %p70_p2, %p69_p1  ;;  %s59_s24 = ssub.s32 %s1037_s19, %s1400_s21 }
   0xc   : > { %p60_p4 = scmp.eq.s32.totalorder %s59_s24, 0  ;;  %s196_s26 = sand.u32 1, %s1029_s17  }
   0xd   : > { %s1130_s28 = sshll.u32 %s196_s26, 4  ;;  %s748_s29 = sshll.u32 %s1037_s19, 8 }
   0xe   : > { %s1128_s27 = scalar_select %p60_p4, %s1029_s17, %s62_s22  }
   0xf   : > { %s1136_s6 = scalar_lea.hbm %s1368_s1, %s748_s29  ;;  %s198_s7 = scalar_lea.vmem [#allocation6], %s1130_s28 }
  0x10   : > { %s205_s8 = sshll.u32 %s198_s7, 4  ;;  %p1143_p6 = pnand %p809_p5, %p1118_p3  ;;  %s1139_s8 = int_to_ptr.vmem [resolvable:$true] %s205_s8 }
  0x11   : > { %s1150_s12 = scalar_lea.hbm %s1369_s2, %s748_s29  ;;  %s1152_s13 = scalar_lea.sflag [#allocation7], %s194_s25 }
  0x12   : > { %s867_s14 = scalar_lea.hbm %s1136_s6, 256  ;;  %p869_p8 = pneg %p1143_p6 }
  0x13   : > { %p868_p7 = scmp.ne.s32.totalorder %s1136_s6, %s867_s14  ;;  %s872_s24 = scalar_lea.hbm %s1368_s1, 1536 }
  0x14   : > { %p873_p11 = scmp.lt.u32.totalorder %s1136_s6, %s1368_s1  ;;  %p874_p12 = scmp.lt.u32.totalorder %s872_s24, %s867_s14 }
  0x15   : > { %p870_p9 = pnand %p869_p8, %p868_p7  ;;  %p876_p0 = scmp.lt.u32.totalorder %s867_s14, %s1136_s6 }
  0x16   : > { %p875_p13 = por %p874_p12, %p873_p11 }
  0x17   : > { %p871_p10 = pneg %p870_p9 }
  0x18   : > { %p877_p2 = por %p876_p0, %p875_p13 }
  0x1a   : > { %p878_p3 = pnand %p877_p2, %p871_p10 }
  0x1c   : > { %881 = shalt.err (!%p878_p3)
}
  0x1d   : > { %s882_s25 = scalar_lea.vmem %s1139_s8, 256  ;;  %s1043_s29 = smov [#allocation6]  }
  0x1e   : > { %p883_p4 = scmp.ne.s32.totalorder %s1139_s8, %s882_s25  ;;  %s887_s5 = sshll.u32 %s1043_s29, 4  ;;  %s888_s5 = int_to_ptr.vmem [resolvable:$false] %s887_s5 }
  0x1f   : > { %s889_s7 = scalar_lea.vmem %s888_s5, 512  ;;  %p890_p9 = scmp.lt.s32.totalorder %s1139_s8, %s888_s5 }
  0x20   : > { %p885_p5 = pnand %p883_p4, %p869_p8  ;;  %p891_p11 = scmp.lt.s32.totalorder %s889_s7, %s882_s25 }
  0x22   : > { %p886_p7 = pneg %p885_p5  ;;  %p892_p12 = por %p891_p11, %p890_p9 }
  0x24   : > { %p893_p13 = pnand %p892_p12, %p886_p7 }
  0x26   : > { %896 = shalt.err (!%p893_p13)
}
  0x27   : > { %s1372_s10 = smov 128   ;;  %s1045_s11 = smov 8  }
  0x28   : > { %800 = dma.hbm_to_vmem [thread:$0]  (!%p1143_p6), %s1136_s6, 256, %s1139_s8, %s1152_s13, %s1372_s10, %s1372_s10, %s1045_s11  }
  0x29   : > { %s219_s14 = scalar_lea.vmem [#allocation8], %s1130_s28  ;;  %s1185_s23 = sadd.s32 4294967295, %s1041_s20  }
  0x2a   : > { %s228_s22 = sshll.u32 %s219_s14, 4  ;;  %s723_s24 = sadd.s32 4294967294, %s1041_s20   ;;  %s1211_s22 = int_to_ptr.vmem [resolvable:$true] %s228_s22 }
  0x2b   : > { %p75_p10 = scmp.ne.s32.totalorder %s1025_s16, %s1021_s15  ;;  %p1374_p0 = scmp.eq.s32.totalorder %s1185_s23, 0 }
  0x2c   : > { %p129_p2 = scmp.eq.s32.totalorder %s1185_s23, 5  ;;  %p135_p3 = scmp.eq.s32.totalorder %s723_s24, 5 }
  0x2d   : > { %p724_p4 = scmp.ge.s32.totalorder %s1041_s20, 1  ;;  %p1195_p5 = por %p1374_p0, %p75_p10 }
  0x2e   : > { %p1202_p7 = por %p129_p2, %p69_p1  ;;  %p1206_p9 = por %p135_p3, %p75_p10 }
  0x2f   : > { %s1380_s6 = scalar_select %p1195_p5, 1, 0 }
  0x30   : > { %s1381_s28 = scalar_select %p1202_p7, 1, 0 }
  0x31   : > { %s1382_s8 = scalar_select %p1206_p9, 1, 0 }
  0x32   : > { %p168_p11 = scmp.lt.s32.totalorder %s1041_s20, 7  ;;  %s1046_s30 = smov [#allocation3]  }
  0x33   : > { %s1217_s25 = sshll.u32 %s1046_s30, 4  ;;  %s897_s29 = scalar_lea.hbm %s1150_s12, 256  ;;  %s181_s25 = int_to_ptr.vmem [resolvable:$true] %s1217_s25 }
  0x34   : > { %p1213_p12 = pnand %p724_p4, %p168_p11  ;;  %p898_p13 = scmp.ne.s32.totalorder %s1150_s12, %s897_s29 }
  0x35   : > { %s902_s14 = scalar_lea.hbm %s1369_s2, 1536  ;;  %p903_p3 = scmp.lt.u32.totalorder %s1150_s12, %s1369_s2 }
  0x36   : > { %s1383_s26 = scalar_select %p1213_p12, 1, 0 }
  0x37   : > { %p900_p10 = pnand %p898_p13, %p869_p8  ;;  %p904_p4 = scmp.lt.u32.totalorder %s902_s14, %s897_s29 }
  0x38   : > { %p906_p0 = scmp.lt.u32.totalorder %s897_s29, %s1150_s12 }
  0x39   : > { %p901_p2 = pneg %p900_p10  ;;  %p905_p11 = por %p904_p4, %p903_p3 }
  0x3b   : > { %p907_p9 = por %p906_p0, %p905_p11 }
  0x3d   : > { %p908_p7 = pnand %p907_p9, %p901_p2 }
  0x3f   : > { %911 = shalt.err (!%p908_p7)
}
  0x40   : > { %s912_s30 = scalar_lea.vmem %s1211_s22, 256  ;;  %s1047_s5 = smov [#allocation8]  }
  0x41   : > { %p913_p13 = scmp.ne.s32.totalorder %s1211_s22, %s912_s30  ;;  %s917_s7 = sshll.u32 %s1047_s5, 4  ;;  %s918_s7 = int_to_ptr.vmem [resolvable:$false] %s917_s7 }
  0x42   : > { %s919_s10 = scalar_lea.vmem %s918_s7, 512  ;;  %p920_p5 = scmp.lt.s32.totalorder %s1211_s22, %s918_s7 }
  0x43   : > { %p915_p10 = pnand %p913_p13, %p869_p8  ;;  %p921_p3 = scmp.lt.s32.totalorder %s919_s10, %s912_s30 }
  0x45   : > { %p916_p1 = pneg %p915_p10  ;;  %p922_p4 = por %p921_p3, %p920_p5 }
  0x47   : > { %p923_p0 = pnand %p922_p4, %p916_p1 }
  0x49   : > { %926 = shalt.err (!%p923_p0)
}
  0x4a   : > { %s1384_s29 = smov 128   ;;  %p1385_p8 = scmp.eq.s32.totalorder %s1185_s23, 0 }
  0x4b   : > { %803 = dma.hbm_to_vmem [thread:$0]  (!%p1143_p6), %s1150_s12, 256, %s1211_s22, %s1152_s13, %s1384_s29, %s1384_s29, %s1045_s11  }
  0x4c   : > { %p1386_p7 = pneg %p1213_p12  ;;  %s927_s30 = scalar_lea.hbm %s1367_s0, 256 }
  0x4d   : > { %p928_p5 = scmp.ne.s32.totalorder %s1367_s0, %s927_s30  ;;  %p934_p11 = scmp.lt.u32.totalorder %s927_s30, %s1367_s0 }
  0x4e   : > { %p1254_p9 = pnand %p1386_p7, %p1385_p8 }
  0x50   : > { %p929_p1 = pneg %p1254_p9 }
  0x52   : > { %p930_p6 = pnand %p929_p1, %p928_p5 }
  0x54   : > { %p931_p2 = pneg %p930_p6 }
  0x56   : > { %p936_p13 = pnand %p934_p11, %p931_p2 }
  0x58   : > { %939 = shalt.err (!%p936_p13)
}
  0x59   : > { %s940_s22 = scalar_lea.vmem %s181_s25, 256  ;;  %p948_p0 = scmp.lt.s32.totalorder %s181_s25, %s181_s25 }
  0x5a   : > { %p941_p10 = scmp.ne.s32.totalorder %s181_s25, %s940_s22  ;;  %p949_p8 = scmp.lt.s32.totalorder %s940_s22, %s940_s22 }
  0x5c   : > { %p943_p3 = pnand %p941_p10, %p929_p1  ;;  %p950_p7 = por %p949_p8, %p948_p0 }
  0x5e   : > { %p944_p4 = pneg %p943_p3 }
  0x60   : > { %p951_p12 = pnand %p950_p7, %p944_p4 }
  0x62   : > { %954 = shalt.err (!%p951_p12)
}
  0x63   : > { %796 = dma.hbm_to_vmem [thread:$0]  (!%p1254_p9), %s1367_s0, 256, %s181_s25, [#allocation4], %s1384_s29, %s1384_s29, %s1045_s11  }
  0x64   : > { %p1388_p5 = scmp.ne.s32.totalorder %s1383_s26, 0 }
  0x65   : > { %p1389_p1 = scmp.eq.s32.totalorder (!%p1388_p5), %s1185_s23, 0 }
  0x66   : > { %240 = sbr.rel (%p1388_p5) target bundleno = 681 (0x2a9), region = 32 }
  0x6d   : > { %1008 = dma.done.wait (%p1389_p1), [#allocation4], 256   ;;  %p1390_p6 = pmov %p1389_p1 }
  0x6e   : > { %s246_s14 = sand.u32 1, %s1185_s23   ;;  %s248_s9 = sand.u32 1, %s1025_s16  }
  0x6f   : > { %1010 = vsyncadd (%p1390_p6), [#allocation4], 4294967040  ;;  %s1287_s30 = sshll.u32 %s248_s9, 4  ;;  %s247_s11 = scalar_lea.sflag [#allocation7], %s246_s14 }
  0x70   : > { %s250_s25 = scalar_lea.vmem [#allocation6], %s1287_s30  ;;  %p1391_p12 = scmp.ne.s32.totalorder %s1380_s6, 0 }
  0x72   : > { %1012 = dma.done.wait (%p1391_p12), %s247_s11, 512  }
  0x73   : > { %1014 = vsyncadd (%p1391_p12), %s247_s11, 4294966784  ;;  %v347_v0 = vld [vmem:[#allocation3] sm:$0xff]  ;;  %v348_v1 = vld [vmem:[#allocation3 + $0x8] sm:$0xff]  ;;  %vm320_vm0 = vcmask 1040384   ;;  %vm327_vm1 = vcmask 1046528   ;;  %vm349_vm2 = vcmask 130048  }
  0x74   : > { %v306_v2 = vld [vmem:[%s250_s25] sm:$0xff]  ;;  %v773_v3 = vpack.c.bf16 %v348_v1, %v347_v0  ;;  %v307_v4 = vld [vmem:[%s250_s25 + $0x8] sm:$0xff]  ;;  %vm301_vm3 = vcmask 523264   ;;  %v1048_v26 = vmov 0.0   ;;  %s1049_s23 = smov 32   ;;  %vm520_vm4 = vcmask 261120  }
  0x75   : > { %v738_v5 = vld [vmem:[%s250_s25 + $0xf] sm:$0x1]  ;;  %v321_v6 = vrot.slane %v306_v2, 7  ;;  %v328_v7 = vrot.slane %v306_v2, 1  ;;  %v329_v8 = vrot.slane %v307_v4, 1  ;;  %v322_v11 = vrot.slane %v307_v4, 7 }
  0x76   : > { %v334_v9 = vrot.slane %v738_v5, 1  ;;  %v312_v10 = vld [vmem:[%s250_s25] sm:$0x1]  ;;  %778 = vmatprep.subr.bf16.mxu1 %v773_v3  ;;  %v337_v12 = vmul.f32 0.75, %v306_v2  ;;  %v338_v13 = vmul.f32 0.75, %v307_v4  ;;  %774 = vmatprep.subr.bf16.mxu0 %v773_v3  ;;  %302 = vst.msk [vmem:[#allocation2] sm:$0xff] %vm301_vm3, %v1048_v26 }
  0x77   : > { %v326_v14 = vsel %vm320_vm0, %v312_v10, %v321_v6  ;;  %780 = vmatpush3.bf16.msra.mxu1 %v773_v3  ;;  %v330_v15 = vsel %vm327_vm1, %v328_v7, %v329_v8  ;;  %776 = vmatpush3.bf16.msra.mxu0 %v773_v3  ;;  %v323_v17 = vsel %vm320_vm0, %v321_v6, %v322_v11  ;;  %s259_s6 = scalar_lea.vmem [#allocation8], %s1287_s30  ;;  %s286_s26 = scalar_lea.vmem [#allocation9], %s1287_s30 }
  0x78   : > { %v336_v16 = vsel %vm327_vm1, %v329_v8, %v334_v9  ;;  %v339_v18 = vmul.f32 0.25, %v326_v14  ;;  %v343_v19 = vmul.f32 0.25, %v330_v15  ;;  %v340_v21 = vmul.f32 0.25, %v323_v17  ;;  %303 = vst.msk [vmem:[#allocation2 + $0x8] sm:$0xff] %vm301_vm3, %v1048_v26  ;;  %v526_v31 = vld [vmem:[%s259_s6] sm:$0xff]  ;;  %v527_v36 = vld [vmem:[%s259_s6 + $0x8] sm:$0xff] }
  0x79   : > { %v344_v20 = vmul.f32 0.25, %v336_v16  ;;  %s577_s29 = sshll.u32 %s286_s26, 4  ;;  %s750_s5 = sshll.u32 %s1033_s18, 8  ;;  %s1306_s29 = int_to_ptr.vmem [resolvable:$true] %s577_s29 }
  0x7a   : > { %v341_v22 = vadd.f32 %v339_v18, %v337_v12  ;;  %v345_v23 = vadd.f32 %v343_v19, %v337_v12  ;;  %v342_v25 = vadd.f32 %v340_v21, %v338_v13  ;;  %s1312_s13 = scalar_lea.hbm %s1370_s3, %s750_s5  ;;  %s1316_s22 = scalar_lea.sflag [#allocation5], %s248_s9 }
  0x7b   : > { %v346_v24 = vadd.f32 %v344_v20, %v338_v13  ;;  %s955_s10 = scalar_lea.vmem %s1306_s29, 256  ;;  %p1392_p2 = scmp.ne.s32.totalorder %s1381_s28, 0 }
  0x7c   : > { %763 = vmatprep.mubr.msk.f32.mxu0 %vm349_vm2, %v341_v22  ;;  %770 = vmatprep.mubr.msk.f32.mxu1 %vm349_vm2, %v345_v23  ;;  %p956_p9 = scmp.ne.s32.totalorder %s1306_s29, %s955_s10  ;;  %s1050_s24 = smov [#allocation9]  }
  0x7d   : > { %764 = vmatmul.mubr.msk.f32.vlgmr.msra.gmra.mrb[0].mxu0 %vm349_vm2, %v342_v25  ;;  %771 = vmatmul.mubr.msk.f32.vlgmr.msra.gmra.mrb[0].mxu1 %vm349_vm2, %v346_v24  ;;  %v532_v35 = vld [vmem:[#allocation2] sm:$0xff]  ;;  %s959_s14 = sshll.u32 %s1050_s24, 4  ;;  %s960_s14 = int_to_ptr.vmem [resolvable:$false] %s959_s14 }
  0x7e   : > { %p957_p11 = pnand %p956_p9, %p1392_p2  ;;  %s961_s30 = scalar_lea.vmem %s960_s14, 512 }
  0x7f   : > { %v533_v42 = vld [vmem:[#allocation2 + $0x8] sm:$0xff]  ;;  %p962_p10 = scmp.lt.s32.totalorder %s1306_s29, %s960_s14  ;;  %p963_p3 = scmp.lt.s32.totalorder %s961_s30, %s955_s10 }
  0x80   : > { %p958_p13 = pneg %p957_p11 }
  0x81   : > { %p964_p4 = por %p963_p3, %p962_p10 }
  0x83   : > { %p965_p0 = pnand %p964_p4, %p958_p13 }
 0x150   : > { %v765_v27 = vpop.f32.mrb[0].mxu0  ;;  %v772_v28 = vpop.f32.mrb[0].mxu1 }
 0x151   : > { %v422_v29 = vpop.f32.mrb[1].mxu0  ;;  %v503_v30 = vpop.f32.mrb[1].mxu1 }
 0x152   : > { %514 = vrot.lane.b32.xlu0 %v503_v30, %s1049_s23 }
 0x156   : > { %516 = vrot.lane.b32.xlu0 %v772_v28, %s1049_s23 }
 0x1c4   : > { %v515_v32 = vpop.permute.xlu0 %514 }
 0x1c5   : > { %v521_v33 = vsel %vm520_vm4, %v422_v29, %v515_v32 }
 0x1c6   : > { %524 = vst.msk [vmem:[%s286_s26] sm:$0xff] %vm301_vm3, %v521_v33  ;;  %v528_v34 = vsub.f32 %v521_v33, %v526_v31 }
 0x1c8   : > { %v530_v37 = vand.u32 2147483647, %v528_v34  ;;  %v517_v38 = vpop.permute.xlu0 %516 }
 0x1c9   : > { %v522_v39 = vsel %vm520_vm4, %v765_v27, %v517_v38 }
 0x1ca   : > { %v534_v40 = vadd.f32 %v532_v35, %v530_v37  ;;  %525 = vst.msk [vmem:[%s286_s26 + $0x8] sm:$0xff] %vm301_vm3, %v522_v39  ;;  %v529_v41 = vsub.f32 %v522_v39, %v527_v36 }
 0x1cc   : > { %536 = vst.msk [vmem:[#allocation2] sm:$0xff] %vm301_vm3, %v534_v40  ;;  %v531_v43 = vand.u32 2147483647, %v529_v41 }
 0x1ce   : > { %v535_v44 = vadd.f32 %v533_v42, %v531_v43 }
 0x1d0   : > { %537 = vst.msk [vmem:[#allocation2 + $0x8] sm:$0xff] %vm301_vm3, %v535_v44 }
 0x1d3   : > { %v541_v45 = vld [vmem:[#allocation2] sm:$0xff] }
 0x1d4   : > { %v543_v47 = vsel %vm301_vm3, %v541_v45, 0.0 }
 0x1d7   : > { %v542_v46 = vld [vmem:[#allocation2 + $0x8] sm:$0xff] }
 0x1d8   : > { %v544_v48 = vsel %vm301_vm3, %v542_v46, 0.0 }
 0x1d9   : > { %v545_v49 = vadd.f32 %v544_v48, %v543_v47 }
 0x1db   : > { %546 = vadd.xlane.f32.xlu1 %v545_v49 }
 0x1dc   : > { %968 = shalt.err (!%p965_p0)
}
 0x1dd   : > { %s969_s9 = scalar_lea.hbm %s1312_s13, 256  ;;  %s973_s23 = scalar_lea.hbm %s1370_s3, 1536 }
 0x1de   : > { %p970_p8 = scmp.ne.s32.totalorder %s1312_s13, %s969_s9  ;;  %p974_p1 = scmp.lt.u32.totalorder %s1312_s13, %s1370_s3 }
 0x1df   : > { %p975_p6 = scmp.lt.u32.totalorder %s973_s23, %s969_s9  ;;  %p977_p9 = scmp.lt.u32.totalorder %s969_s9, %s1312_s13 }
 0x1e0   : > { %p971_p7 = pnand %p970_p8, %p1392_p2 }
 0x1e1   : > { %p976_p12 = por %p975_p6, %p974_p1 }
 0x1e2   : > { %p972_p5 = pneg %p971_p7 }
 0x1e3   : > { %p978_p11 = por %p977_p9, %p976_p12 }
 0x1e5   : > { %p979_p13 = pnand %p978_p11, %p972_p5 }
 0x1e7   : > { %982 = shalt.err (!%p979_p13)
}
 0x1e8   : > { %s1051_s5 = smov 128   ;;  %s1052_s7 = smov 8   ;;  %vm556_vm5 = vcmask 0  }
 0x1e9   : > { %791 = dma.vmem_to_hbm [thread:$0]  (%p1392_p2), %s1306_s29, 256, %s1312_s13, %s1316_s22, %s1051_s5, %s1051_s5, %s1052_s7  }
 0x1ea   : > { %p294_p10 = scmp.lt.s32.totalorder %s1033_s18, 5 }
 0x1ec   : > { %s1402_s18 = smov (!%p294_p10, %s1033_s18), 5 }
 0x1ed   : > { %s296_s24 = scalar_lea.vmem %s1371_s4, %s1402_s18 }
 0x268   : > { %v547_v50 = vpop.xlane.xlu1 %546 }
 0x269   : > { %v548_v51 = vrot.slane %v547_v50, 4 }
 0x26b   : > { %v549_v52 = vadd.f32 %v548_v51, %v547_v50 }
 0x26d   : > { %v550_v53 = vrot.slane %v549_v52, 2 }
 0x26f   : > { %v551_v54 = vadd.f32 %v550_v53, %v549_v52 }
 0x271   : > { %v552_v55 = vrot.slane %v551_v54, 1 }
 0x273   : > { %v553_v56 = vadd.f32 %v552_v55, %v551_v54 }
 0x275   : > { %781 = vpush %v553_v56 }
 0x2a6   : > { %s782_s14 = spop %781 }
 0x2a7   : > { %v555_v57 = vstv %s782_s14 }
 0x2a8   : > { %557 = vst.msk [vmem:[%s296_s24] sm:$0x1] %vm556_vm5, %v555_v57 }
 0x2a9 PF: > { %p811_p2 = scmp.ge.s32.totalorder %s1041_s20, 2  ;;  %s595_s28 = sand.u32 1, %s1021_s15  }
 0x2aa   : > { %p1393_p3 = scmp.ne.s32.totalorder %s1382_s8, 0  ;;  %s596_s29 = scalar_lea.sflag [#allocation5], %s595_s28 }
 0x2ac   : > { %p805_p4 = pnand %p811_p2, %p1393_p3 }
 0x2ae   : > { %1016 = dma.done.wait (!%p805_p4), %s596_s29, 256  }
 0x2af   : > { %1018 = vsyncadd (!%p805_p4), %s596_s29, 4294967040  ;;  %s22_s20 = sadd.s32 1, %s1041_s20   ;;  %s1394_s15 = smov %s1025_s16 }
 0x2b0   : > { %p19_p0 = scmp.ge.s32.totalorder %s22_s20, 8   ;;  %s1395_s16 = smov %s1029_s17 }
 0x2b1   : > { %s1396_s17 = smov %s1128_s27  ;;  %s1397_s18 = smov %s1037_s19 }
 0x2b2   : > { %s1398_s19 = smov %s1400_s21  ;;  %21 = sbr.rel (!%p19_p0) target bundleno = 7 (0x7), region = 116 }
 0x2b9   :  { %607 = vsyncpa [#allocation4], 1 }
 0x2ba   :  { %609 = vsyncpa [#allocation4 + $0x1], 1 }
 0x2bb   :  { %610 = vsyncpa [#allocation7], 1 }
 0x2bc   :  { %612 = vsyncpa [#allocation7 + $0x1], 1 }
 0x2bd   :  { %613 = vsyncpa [#allocation5], 1 }
 0x2be   :  { %615 = vsyncpa [#allocation5 + $0x1], 1 }

</bundles_post_ra>
